<compile_context>
chip_gen: v7x
topology: tpu7x:2x2x1
jax: 0.10.0
libtpu: 0.0.40
codegen_flags: <defaults>
</compile_context>

<pallas_src>
import functools

import jax
import jax.numpy as jnp
from jax import lax
from jax.experimental import pallas as pl
from jax.experimental.pallas import tpu as pltpu


def resnet_noback_kernel(x_ref, w1_ref, b1_ref, w2_ref, b2_ref, o_ref, *,
                         n_rows, inv_n):
    """One grid step = apply residual function i to one batch element.

    x_ref / o_ref : (H, W*C) f32 slab of one image (o_ref is the carried state).
    w*_ref        : (1, 3*W*C, W*C) bf16 block-banded conv matrix of function i.
    b*_ref        : (1, 1, W*C) f32 lane-dense bias row.
    """
    i = pl.program_id(1)

    @pl.when(i == 0)
    def _():                                   # load carried state once per image
        o_ref[...] = x_ref[...]

    x = o_ref[...]                             # (H, W*C) f32, VMEM-resident
    row = lax.broadcasted_iota(jnp.int32, x.shape, 0)

    def conv3x3(inp, w_ref, b_ref):
        # +/-1 image-row shifts with zero padding: XLU sublane rotate, then mask
        # off the wrapped row (which is exactly the out-of-image row).
        up = jnp.where(row == n_rows - 1, 0.0, pltpu.roll(inp, n_rows - 1, axis=0))
        dn = jnp.where(row == 0, 0.0, pltpu.roll(inp, 1, axis=0))
        # Single lane-dense MXU matmul: (H, 3*W*C) @ (3*W*C, W*C), bf16 in, f32 acc.
        a = jnp.concatenate([dn, inp, up], axis=-1).astype(jnp.bfloat16)
        return jnp.dot(a, w_ref[0], preferred_element_type=jnp.float32) + b_ref[0]

    h = jnp.maximum(conv3x3(x, w1_ref, b1_ref), 0.0)       # ReLU in f32
    f = conv3x3(h, w2_ref, b2_ref)
    o_ref[...] = x + f * inv_n                              # x += f_i(x) / n_iters


def _expand_conv_weight(w, width):
    """(N, 3, 3, Cin, Cout) HWIO conv weights -> (N, 3*W*C, W*C) block-banded
    matrices so that a 'same' 3x3 conv on a (H, W*C) slab becomes one matmul:
        out_slab = [x(h-1) | x(h) | x(h+1)] @ M
    The W-axis taps and the W-boundary zero padding are folded into M."""
    n, _, _, c, _ = w.shape
    wc = width * c
    rows = []
    for ky in range(3):                      # dh = ky - 1, pairs with x(h+dh)
        m = jnp.zeros((n, wc, wc), w.dtype)
        for kx in range(3):                  # dw = kx - 1
            shift = jnp.eye(width, k=-(kx - 1), dtype=w.dtype)   # S[w+dw, w] = 1
            m = m + jnp.einsum('ab,ncd->nacbd', shift,
                               w[:, ky, kx]).reshape(n, wc, wc)
        rows.append(m)
    return jnp.concatenate(rows, axis=1)     # (N, 3*W*C, W*C)


def _expand_bias(b, width):
    """(N, 1, 1, 1, C) -> (N, 1, W*C) lane-dense bias rows (channel c at w*C+c)."""
    n, c = b.shape[0], b.shape[-1]
    return jnp.tile(b.reshape(n, 1, c), (1, 1, width))


@jax.jit
def resnet_no_backprop_forward(x_nchw, w1, b1, w2, b2):
    """x_nchw: (B, C, H, W) float32 (PyTorch convention). Returns (B, C, H, W)."""
    B, C, H, W = x_nchw.shape
    N = w1.shape[0]
    WC = W * C

    # NCHW -> lane-dense (B*H, W*C) slab (channels fastest within a lane group).
    x2d = jnp.transpose(x_nchw, (0, 2, 3, 1)).reshape(B * H, WC)

    w1m = _expand_conv_weight(w1, W).astype(jnp.bfloat16)
    w2m = _expand_conv_weight(w2, W).astype(jnp.bfloat16)
    b1r = _expand_bias(b1, W).astype(jnp.float32)
    b2r = _expand_bias(b2, W).astype(jnp.float32)

    kern = functools.partial(resnet_noback_kernel, n_rows=H, inv_n=1.0 / N)
    out2d = pl.pallas_call(
        kern,
        out_shape=jax.ShapeDtypeStruct((B * H, WC), x2d.dtype),
        grid_spec=pltpu.PrefetchScalarGridSpec(
            num_scalar_prefetch=0,
            grid=(B, N),                                    # (batch, function)
            in_specs=[
                pl.BlockSpec((H, WC), lambda b, i: (b, 0)),              # x
                pl.BlockSpec((1, 3 * WC, WC), lambda b, i: (i, 0, 0)),   # w1 band
                pl.BlockSpec((1, 1, WC), lambda b, i: (i, 0, 0)),        # b1 row
                pl.BlockSpec((1, 3 * WC, WC), lambda b, i: (i, 0, 0)),   # w2 band
                pl.BlockSpec((1, 1, WC), lambda b, i: (i, 0, 0)),        # b2 row
            ],
            out_specs=pl.BlockSpec((H, WC), lambda b, i: (b, 0)),
        ),
        compiler_params=pltpu.CompilerParams(
            dimension_semantics=("parallel", "arbitrary")),
        input_output_aliases={0: 0},                        # reuse x HBM buffer
    )(x2d, w1m, b1r, w2m, b2r)

    out = out2d.reshape(B, H, W, C)
    return jnp.transpose(out, (0, 3, 1, 2))                 # back to NCHW


def reference_forward(x_nchw, w1, b1, w2, b2):
    """Pure-JAX f32 reference of the same forward (for correctness checking)."""
    x = jnp.transpose(x_nchw, (0, 2, 3, 1)).astype(jnp.float32)
    B, H, W, C = x.shape
    N = w1.shape[0]

    def conv(h, w, b):
        hp = jnp.pad(h, ((0, 0), (1, 1), (1, 1), (0, 0)))
        out = jnp.zeros_like(h)
        for ky in range(3):
            for kx in range(3):
                out = out + jnp.einsum(
                    'bhwc,cd->bhwd', hp[:, ky:ky + H, kx:kx + W, :], w[ky, kx],
                    precision=lax.Precision.HIGHEST)
        return out + b

    for i in range(N):
        h = jnp.maximum(conv(x, w1[i], b1[i]), 0.0)
        f = conv(h, w2[i], b2[i])
        x = x + f / N
    return jnp.transpose(x, (0, 3, 1, 2))


if __name__ == "__main__":
    B, C, H, W = 2, 8, 16, 16          # W * C = 128 -> fully lane-dense slabs
    N_FUNCTIONS = 4

    key = jax.random.PRNGKey(0)
    kx, kw1, kb1, kw2, kb2 = jax.random.split(key, 5)

    x = jax.random.normal(kx, (B, C, H, W), jnp.float32)
    # Deterministic synthetic parameters: one conv-relu-conv block per function.
    w1 = 0.1 * jax.random.normal(kw1, (N_FUNCTIONS, 3, 3, C, C), jnp.float32)
    b1 = 0.1 * jax.random.normal(kb1, (N_FUNCTIONS, 1, 1, 1, C), jnp.float32)
    w2 = 0.1 * jax.random.normal(kw2, (N_FUNCTIONS, 3, 3, C, C), jnp.float32)
    b2 = 0.1 * jax.random.normal(kb2, (N_FUNCTIONS, 1, 1, 1, C), jnp.float32)

    out = jax.block_until_ready(resnet_no_backprop_forward(x, w1, b1, w2, b2))
    ref = jax.block_until_ready(reference_forward(x, w1, b1, w2, b2))

    assert out.shape == x.shape and out.dtype == x.dtype
    if not bool(jnp.allclose(out, ref, atol=5e-2, rtol=5e-2)):
        raise AssertionError("Pallas kernel does not match JAX reference")

    print("KERNEL_OK")
</pallas_src>

<mosaic_0001>
module attributes {stable_mosaic.version = 11 : i64} {
  func.func @resnet_noback_kernel(%arg0: i32, %arg1: i32, %arg2: memref<16x128xf32, #tpu.memory_space<vmem>>, %arg3: memref<1x384x128xbf16, #tpu.memory_space<vmem>>, %arg4: memref<1x1x128xf32, #tpu.memory_space<vmem>>, %arg5: memref<1x384x128xbf16, #tpu.memory_space<vmem>>, %arg6: memref<1x1x128xf32, #tpu.memory_space<vmem>>, %arg7: memref<16x128xf32, #tpu.memory_space<vmem>>) attributes {dimension_semantics = [#tpu.dimension_semantics<parallel>, #tpu.dimension_semantics<arbitrary>], iteration_bounds = array<i64: 2, 4>, scalar_prefetch = 0 : i64, scratch_operands = 0 : i64, tpu.core_type = #tpu.core_type<tc>, window_params = [{transform_indices = @transform_0, window_bounds = array<i64: 16, 128>}, {transform_indices = @transform_1, window_bounds = array<i64: 1, 384, 128>}, {transform_indices = @transform_2, window_bounds = array<i64: 1, 1, 128>}, {transform_indices = @transform_3, window_bounds = array<i64: 1, 384, 128>}, {transform_indices = @transform_4, window_bounds = array<i64: 1, 1, 128>}, {transform_indices = @transform_5, window_bounds = array<i64: 16, 128>}]} {
    %c0_i32 = arith.constant 0 : i32
    %0 = arith.cmpi eq, %arg1, %c0_i32 : i32
    %1 = arith.extui %0 : i1 to i32
    %c0_i32_0 = arith.constant 0 : i32
    %2 = arith.cmpi ne, %1, %c0_i32_0 : i32
    scf.if %2 {
      %c0_29 = arith.constant 0 : index
      %c0_30 = arith.constant 0 : index
      %49 = vector.load %arg2[%c0_29, %c0_30] : memref<16x128xf32, #tpu.memory_space<vmem>>, vector<16x128xf32>
      %c0_31 = arith.constant 0 : index
      %c0_32 = arith.constant 0 : index
      %50 = vector.load %arg7[%c0_31, %c0_32] : memref<16x128xf32, #tpu.memory_space<vmem>>, vector<16x128xf32>
      tpu.vector_store %arg7[%c0_31, %c0_32], %49 {strides = array<i32>} : memref<16x128xf32, #tpu.memory_space<vmem>>, vector<16x128xf32>,
    } else {
    }
    %c0 = arith.constant 0 : index
    %c0_1 = arith.constant 0 : index
    %3 = vector.load %arg7[%c0, %c0_1] : memref<16x128xf32, #tpu.memory_space<vmem>>, vector<16x128xf32>
    %4 = tpu.iota {dimensions = array<i32: 0>} : vector<16x128xi32>
    %c15_i32 = arith.constant 15 : i32
    %5 = vector.broadcast %c15_i32 : i32 to vector<16x128xi32>
    %6 = arith.cmpi eq, %4, %5 : vector<16x128xi32>
    %c15_i32_2 = arith.constant 15 : i32
    %7 = tpu.dynamic_rotate %3 by %c15_i32_2 dim 0 : vector<16x128xf32>, i32 -> vector<16x128xf32>
    %cst = arith.constant 0.000000e+00 : f32
    %8 = vector.broadcast %cst : f32 to vector<16x128xf32>
    %9 = arith.select %6, %8, %7 : vector<16x128xi1>, vector<16x128xf32>
    %c0_i32_3 = arith.constant 0 : i32
    %10 = vector.broadcast %c0_i32_3 : i32 to vector<16x128xi32>
    %11 = arith.cmpi eq, %4, %10 : vector<16x128xi32>
    %c1_i32 = arith.constant 1 : i32
    %12 = tpu.dynamic_rotate %3 by %c1_i32 dim 0 : vector<16x128xf32>, i32 -> vector<16x128xf32>
    %cst_4 = arith.constant 0.000000e+00 : f32
    %13 = vector.broadcast %cst_4 : f32 to vector<16x128xf32>
    %14 = arith.select %11, %13, %12 : vector<16x128xi1>, vector<16x128xf32>
    %15 = tpu.concatenate %14, %3, %9 in 1 : vector<16x128xf32>, vector<16x128xf32>, vector<16x128xf32> -> vector<16x384xf32>
    %16 = arith.truncf %15 : vector<16x384xf32> to vector<16x384xbf16>
    %c0_5 = arith.constant 0 : index
    %c0_6 = arith.constant 0 : index
    %c0_7 = arith.constant 0 : index
    %17 = vector.load %arg3[%c0_5, %c0_6, %c0_7] : memref<1x384x128xbf16, #tpu.memory_space<vmem>>, vector<1x384x128xbf16>
    %18 = vector.shape_cast %17 : vector<1x384x128xbf16> to vector<384x128xbf16>
    %cst_8 = arith.constant dense<0.000000e+00> : vector<16x128xf32>
    %19 = tpu.matmul %16, %18, %cst_8 {dimension_numbers = #tpu.dot_dimension_numbers<[1], [0], [0], [1], [0, 0, 1, 1], [], []>} : vector<16x384xbf16>, vector<384x128xbf16>, vector<16x128xf32> -> vector<16x128xf32>
    %c0_9 = arith.constant 0 : index
    %c0_10 = arith.constant 0 : index
    %c0_11 = arith.constant 0 : index
    %20 = vector.load %arg4[%c0_9, %c0_10, %c0_11] : memref<1x1x128xf32, #tpu.memory_space<vmem>>, vector<1x1x128xf32>
    %21 = vector.shape_cast %20 : vector<1x1x128xf32> to vector<1x128xf32>
    %22 = vector.broadcast %21 : vector<1x128xf32> to vector<16x128xf32>
    %23 = arith.addf %19, %22 : vector<16x128xf32>
    %cst_12 = arith.constant 0.000000e+00 : f32
    %24 = vector.broadcast %cst_12 : f32 to vector<16x128xf32>
    %25 = arith.maximumf %23, %24 : vector<16x128xf32>
    %c15_i32_13 = arith.constant 15 : i32
    %26 = vector.broadcast %c15_i32_13 : i32 to vector<16x128xi32>
    %27 = arith.cmpi eq, %4, %26 : vector<16x128xi32>
    %c15_i32_14 = arith.constant 15 : i32
    %28 = tpu.dynamic_rotate %25 by %c15_i32_14 dim 0 : vector<16x128xf32>, i32 -> vector<16x128xf32>
    %cst_15 = arith.constant 0.000000e+00 : f32
    %29 = vector.broadcast %cst_15 : f32 to vector<16x128xf32>
    %30 = arith.select %27, %29, %28 : vector<16x128xi1>, vector<16x128xf32>
    %c0_i32_16 = arith.constant 0 : i32
    %31 = vector.broadcast %c0_i32_16 : i32 to vector<16x128xi32>
    %32 = arith.cmpi eq, %4, %31 : vector<16x128xi32>
    %c1_i32_17 = arith.constant 1 : i32
    %33 = tpu.dynamic_rotate %25 by %c1_i32_17 dim 0 : vector<16x128xf32>, i32 -> vector<16x128xf32>
    %cst_18 = arith.constant 0.000000e+00 : f32
    %34 = vector.broadcast %cst_18 : f32 to vector<16x128xf32>
    %35 = arith.select %32, %34, %33 : vector<16x128xi1>, vector<16x128xf32>
    %36 = tpu.concatenate %35, %25, %30 in 1 : vector<16x128xf32>, vector<16x128xf32>, vector<16x128xf32> -> vector<16x384xf32>
    %37 = arith.truncf %36 : vector<16x384xf32> to vector<16x384xbf16>
    %c0_19 = arith.constant 0 : index
    %c0_20 = arith.constant 0 : index
    %c0_21 = arith.constant 0 : index
    %38 = vector.load %arg5[%c0_19, %c0_20, %c0_21] : memref<1x384x128xbf16, #tpu.memory_space<vmem>>, vector<1x384x128xbf16>
    %39 = vector.shape_cast %38 : vector<1x384x128xbf16> to vector<384x128xbf16>
    %cst_22 = arith.constant dense<0.000000e+00> : vector<16x128xf32>
    %40 = tpu.matmul %37, %39, %cst_22 {dimension_numbers = #tpu.dot_dimension_numbers<[1], [0], [0], [1], [0, 0, 1, 1], [], []>} : vector<16x384xbf16>, vector<384x128xbf16>, vector<16x128xf32> -> vector<16x128xf32>
    %c0_23 = arith.constant 0 : index
    %c0_24 = arith.constant 0 : index
    %c0_25 = arith.constant 0 : index
    %41 = vector.load %arg6[%c0_23, %c0_24, %c0_25] : memref<1x1x128xf32, #tpu.memory_space<vmem>>, vector<1x1x128xf32>
    %42 = vector.shape_cast %41 : vector<1x1x128xf32> to vector<1x128xf32>
    %43 = vector.broadcast %42 : vector<1x128xf32> to vector<16x128xf32>
    %44 = arith.addf %40, %43 : vector<16x128xf32>
    %cst_26 = arith.constant 2.500000e-01 : f32
    %45 = vector.broadcast %cst_26 : f32 to vector<16x128xf32>
    %46 = arith.mulf %44, %45 : vector<16x128xf32>
    %47 = arith.addf %3, %46 : vector<16x128xf32>
    %c0_27 = arith.constant 0 : index
    %c0_28 = arith.constant 0 : index
    %48 = vector.load %arg7[%c0_27, %c0_28] : memref<16x128xf32, #tpu.memory_space<vmem>>, vector<16x128xf32>
    tpu.vector_store %arg7[%c0_27, %c0_28], %47 {strides = array<i32>} : memref<16x128xf32, #tpu.memory_space<vmem>>, vector<16x128xf32>,
    return
  }
  func.func @transform_0(%arg0: i32, %arg1: i32) -> (i32, i32) {
    %c0_i32 = arith.constant 0 : i32
    %c0_i32_0 = arith.constant 0 : i32
    return %arg0, %c0_i32 : i32, i32
  }
  func.func @transform_1(%arg0: i32, %arg1: i32) -> (i32, i32, i32) {
    %c0_i32 = arith.constant 0 : i32
    %c0_i32_0 = arith.constant 0 : i32
    %c0_i32_1 = arith.constant 0 : i32
    return %arg1, %c0_i32, %c0_i32_0 : i32, i32, i32
  }
  func.func @transform_2(%arg0: i32, %arg1: i32) -> (i32, i32, i32) {
    %c0_i32 = arith.constant 0 : i32
    %c0_i32_0 = arith.constant 0 : i32
    %c0_i32_1 = arith.constant 0 : i32
    return %arg1, %c0_i32, %c0_i32_0 : i32, i32, i32
  }
  func.func @transform_3(%arg0: i32, %arg1: i32) -> (i32, i32, i32) {
    %c0_i32 = arith.constant 0 : i32
    %c0_i32_0 = arith.constant 0 : i32
    %c0_i32_1 = arith.constant 0 : i32
    return %arg1, %c0_i32, %c0_i32_0 : i32, i32, i32
  }
  func.func @transform_4(%arg0: i32, %arg1: i32) -> (i32, i32, i32) {
    %c0_i32 = arith.constant 0 : i32
    %c0_i32_0 = arith.constant 0 : i32
    %c0_i32_1 = arith.constant 0 : i32
    return %arg1, %c0_i32, %c0_i32_0 : i32, i32, i32
  }
  func.func @transform_5(%arg0: i32, %arg1: i32) -> (i32, i32) {
    %c0_i32 = arith.constant 0 : i32
    %c0_i32_0 = arith.constant 0 : i32
    return %arg0, %c0_i32 : i32, i32
  }
}

</mosaic_0001>

<bundles_post_ra>
// kernel: resnet_no_backprop_forward.1
= control target key start
LH: loop header
LB: loop body
LE: loop exit
PB: predicated region body
PF: predicated region fallthrough
CT: control target
= control target key end

     0   :  { %s1387_s18 = smov 0   ;;  %s1389_s19 = smov 0   ;;  %s1602_s0 = inlined_call_operand.vmem [shape: f32[32,128], index: 0, kind: input, shape index: {}, may-alias: {0,5}]   ;;  %s1603_s1 = inlined_call_operand.vmem [shape: bf16[4,384,128], index: 1, kind: input, shape index: {}]   ;;  %s1604_s2 = inlined_call_operand.vmem [shape: f32[4,1,128], index: 2, kind: input, shape index: {}]   ;;  %s1605_s3 = inlined_call_operand.vmem [shape: bf16[4,384,128], index: 3, kind: input, shape index: {}]   ;;  %s1606_s4 = inlined_call_operand.vmem [shape: f32[4,1,128], index: 4, kind: input, shape index: {}]   ;;  %s1607_s5 = inlined_call_operand.vmem [shape: f32[32,128], index: 5, kind: output, shape index: {}, may-alias: {0,5}]  }
   0x1   :  { %s1391_s20 = smov 0   ;;  %s1393_s21 = smov 0  }
   0x2   :  { %s1395_s22 = smov 0  }
   0x3 LB: > { %s24_s23 = sadd.s32 1, %s1344_s20  ;;  %s27_s24 = sadd.s32 1, %s1348_s21  ;;  %s1352_s22 = sphi %s1395_s22, %s15_s22   ;;  %s1348_s21 = sphi %s1393_s21, %s1615_s21   ;;  %s1344_s20 = sphi %s1391_s20, %s1614_s20   ;;  %s1340_s19 = sphi %s1389_s19, %s1613_s19   ;;  %s1336_s18 = sphi %s1387_s18, %s1612_s18  }
   0x4   : > { %p25_p0 = scmp.ge.s32.totalorder %s24_s23, 4  ;;  %p1042_p1 = scmp.ge.s32.totalorder %s1352_s22, 1 }
   0x5   : > { %p236_p2 = scmp.lt.s32.totalorder %s1352_s22, 9 }
   0x6   : > { %s1617_s23 = smov (%p25_p0, %s24_s23), 0  ;;  %s1619_s24 = smov (!%p25_p0, %s27_s24), %s1348_s21 }
   0x7   : > { %p237_p3 = pnand %p1042_p1, %p236_p2  ;;  %p29_p4 = scmp.ge.s32.totalorder %s1619_s24, 2 }
   0x8   : > { %s1043_s25 = sshll.u32 (!%p237_p3), %s1340_s19, 1  ;;  %p286_p5 = scmp.lt.s32.totalorder (!%p237_p3), %s1336_s18, 3 }
   0x9   : > { %s1621_s24 = smov (%p29_p4, %s1619_s24), 0  ;;  %240 = sbr.rel (%p237_p3) target bundleno = 511 (0x1ff), region = 40 }
   0xa   : > { %p281_p6 = scmp.lt.s32.totalorder (!%p237_p3), %s1043_s25, 3  ;;  %p1049_p7 = scmp.ne.s32.totalorder (!%p237_p3), %s1336_s18, 0 }
  0x10   : > { %s1421_s26 = scalar_select %p286_p5, %s1336_s18, 3 }
  0x11   : > { %s1623_s25 = smov (!%p281_p6, %s1043_s25), 3  ;;  %312 = sbr.rel (%p1049_p7) target bundleno = 24 (0x18), region = 44 }
  0x12   : > { %s1222_s27 = smul.u32 192, %s1421_s26  ;;  %s293_s30 = scalar_lea.vmem %s1604_s2, %s1421_s26 }
  0x13   : > { %s1044_s6 = sshll.u32 %s1623_s25, 3  ;;  %s301_s9 = scalar_lea.vmem %s1606_s4, %s1421_s26 }
  0x14   : > { %s284_s12 = scalar_lea.vmem %s1602_s0, %s1044_s6  ;;  %s1438_s15 = scalar_lea.vmem %s1603_s1, %s1222_s27 }
  0x15   : > { %s1443_s19 = scalar_lea.vmem %s1605_s3, %s1222_s27  ;;  %s1448_s29 = scalar_lea.vmem %s1607_s5, %s1044_s6  ;;  %v313_v0 = vld [vmem:[%s284_s12] sm:$0xff] (!%p1049_p7)  ;;  %v314_v1 = vld [vmem:[%s284_s12 + $0x8] sm:$0xff] (!%p1049_p7) }
  0x16   : > { %315 = vst [vmem:[%s1448_s29] sm:$0xff] (!%p1049_p7), %v313_v0  ;;  %316 = vst [vmem:[%s1448_s29 + $0x8] sm:$0xff] (!%p1049_p7), %v314_v1 }
  0x18 PF: > { %v1266_v2 = vld [vmem:[%s1438_s15 + $0x40] sm:$0xff]   ;;  %v1354_v4 = vmov 0.0   ;;  %v1269_v6 = vld [vmem:[%s1438_s15 + $0x48] sm:$0xff]   ;;  %vm1355_vm0 = vmmov 0   ;;  %v1272_v9 = vld [vmem:[%s1438_s15 + $0x50] sm:$0xff]   ;;  %v319_v16 = vlaneseq  ;;  %vm1356_vm5 = vmmov 1  }
  0x19   : > { %v1267_v3 = vld [vmem:[%s1438_s15] sm:$0xff]   ;;  %1182 = vmatprep.subr.bf16.mxu1 %v1354_v4  ;;  %1120 = vmatprep.subr.bf16.mxu0 %v1266_v2  ;;  %v1270_v7 = vld [vmem:[%s1438_s15 + $0x8] sm:$0xff]   ;;  %v1273_v10 = vld [vmem:[%s1438_s15 + $0x10] sm:$0xff]  }
  0x1a   : > { %v1268_v5 = vld [vmem:[%s1438_s15 + $0x80] sm:$0xff]   ;;  %1121 = vmatpush3.bf16.msra.mxu0 %v1267_v3  ;;  %1198 = vmatprep.mubr.msk.bf16.mxu1 %vm1355_vm0, %v1354_v4  ;;  %v1271_v8 = vld [vmem:[%s1438_s15 + $0x88] sm:$0xff]   ;;  %v1274_v11 = vld [vmem:[%s1438_s15 + $0x90] sm:$0xff]   ;;  %v1476_v20 = vshrl.u32 %v319_v16, 7 }
  0x1b   : > { %1183 = vmatpush3.bf16.msra.mxu1 %v1268_v5  ;;  %1122 = vmatprep.subr.bf16.mxu0 %v1269_v6  ;;  %v1275_v12 = vld [vmem:[%s1438_s15 + $0x58] sm:$0xff]   ;;  %v1278_v15 = vld [vmem:[%s1438_s15 + $0x60] sm:$0xff]   ;;  %v1281_v19 = vld [vmem:[%s1438_s15 + $0x68] sm:$0xff]  }
  0x1c   : > { %1184 = vmatprep.subr.bf16.mxu1 %v1354_v4  ;;  %v1276_v13 = vld [vmem:[%s1438_s15 + $0x18] sm:$0xff]   ;;  %v1279_v17 = vld [vmem:[%s1438_s15 + $0x20] sm:$0xff]   ;;  %v1282_v21 = vld [vmem:[%s1438_s15 + $0x28] sm:$0xff]   ;;  %vm335_vm1 = vcmp.lt.s32.totalorder %v1476_v20, 1  ;;  %v321_v26 = vadd.s32 8, %v1476_v20  ;;  %vm1118_vm2 = vcmp.ne.s32.totalorder %v1476_v20, 0 }
  0x1d   : > { %v1277_v14 = vld [vmem:[%s1438_s15 + $0x98] sm:$0xff]   ;;  %v1280_v18 = vld [vmem:[%s1438_s15 + $0xa0] sm:$0xff]   ;;  %v1283_v22 = vld [vmem:[%s1438_s15 + $0xa8] sm:$0xff]   ;;  %vm326_vm3 = vcmp.lt.s32.totalorder %v1476_v20, 7 }
  0x1e   : > { %1123 = vmatpush3.bf16.msra.mxu0 %v1270_v7  ;;  %v1284_v23 = vld [vmem:[%s1438_s15 + $0x70] sm:$0xff]   ;;  %v1487_v27 = vld [vmem:[%s1448_s29] sm:$0xff]  ;;  %v1490_v28 = vld [vmem:[%s1448_s29 + $0x8] sm:$0xff]  ;;  %vm1119_vm4 = vcmp.ne.s32.totalorder %v321_v26, 15 }
  0x1f   : > { %1185 = vmatpush3.bf16.msra.mxu1 %v1271_v8  ;;  %1124 = vmatprep.subr.bf16.mxu0 %v1272_v9  ;;  %v1285_v24 = vld [vmem:[%s1438_s15 + $0x30] sm:$0xff]   ;;  %v1287_v29 = vld [vmem:[%s1438_s15 + $0x78] sm:$0xff]   ;;  %v324_v30 = vrot.slane %v1487_v27, 1  ;;  %v333_v31 = vrot.slane %v1487_v27, 7  ;;  %v341_v32 = vpack.c.bf16 %v1490_v28, %v1487_v27  ;;  %v334_v33 = vrot.slane %v1490_v28, 7  ;;  %vm1510_vm6 = vmpackc.low %vm1356_vm5, %vm1118_vm2 }
  0x20   : > { %1186 = vmatprep.subr.bf16.mxu1 %v1354_v4  ;;  %v1286_v25 = vld [vmem:[%s1438_s15 + $0xb0] sm:$0xff]   ;;  %v1288_v34 = vld [vmem:[%s1438_s15 + $0x38] sm:$0xff]   ;;  %v325_v35 = vrot.slane %v1490_v28, 1  ;;  %v1290_v42 = vld [vmem:[%s1443_s19 + $0x40] sm:$0xff]  }
  0x21   : > { %574 = vmatprep.mubr.bf16.mxu0 %v341_v32  ;;  %v1289_v36 = vld [vmem:[%s1438_s15 + $0xb8] sm:$0xff]   ;;  %v336_v37 = vsel %vm335_vm1, %v333_v31, %v334_v33  ;;  %v337_v38 = vsel %vm335_vm1, %v334_v33, %v333_v31  ;;  %vm1520_vm7 = vmpackc.low %vm1119_vm4, %vm1356_vm5  ;;  %v1291_v45 = vld [vmem:[%s1443_s19] sm:$0xff]  }
  0x22   : > { %1125 = vmatpush3.bf16.msra.mxu0 %v1273_v10  ;;  %v327_v40 = vsel %vm326_vm3, %v324_v30, %v325_v35  ;;  %v328_v41 = vsel %vm326_vm3, %v325_v35, %v324_v30  ;;  %v1077_v44 = vpack.c.bf16 %v336_v37, %v337_v38  ;;  %v1292_v47 = vld [vmem:[%s1443_s19 + $0x80] sm:$0xff]   ;;  %v1293_v48 = vld [vmem:[%s1443_s19 + $0x48] sm:$0xff]   ;;  %v1296_v51 = vld [vmem:[%s1443_s19 + $0x50] sm:$0xff]  }
  0x23   : > { %1187 = vmatpush3.bf16.msra.mxu1 %v1274_v11  ;;  %1126 = vmatprep.subr.bf16.mxu0 %v1275_v12  ;;  %v1081_v46 = vpack.c.bf16 %v328_v41, %v327_v40  ;;  %v1294_v49 = vld [vmem:[%s1443_s19 + $0x8] sm:$0xff]   ;;  %v1297_v52 = vld [vmem:[%s1443_s19 + $0x10] sm:$0xff]   ;;  %v1299_v54 = vld [vmem:[%s1443_s19 + $0x58] sm:$0xff]  }
  0x24   : > { %1188 = vmatprep.subr.bf16.mxu1 %v1354_v4  ;;  %v1295_v50 = vld [vmem:[%s1443_s19 + $0x88] sm:$0xff]   ;;  %v1298_v53 = vld [vmem:[%s1443_s19 + $0x90] sm:$0xff]   ;;  %v1300_v55 = vld [vmem:[%s1443_s19 + $0x18] sm:$0xff]  }
  0x25   : > { %v1301_v56 = vld [vmem:[%s1443_s19 + $0x98] sm:$0xff]   ;;  %v1302_v57 = vld [vmem:[%s1443_s19 + $0x60] sm:$0xff]   ;;  %v1305_v60 = vld [vmem:[%s1443_s19 + $0x68] sm:$0xff]  }
  0x26   : > { %1127 = vmatpush3.bf16.msra.mxu0 %v1276_v13  ;;  %v1303_v58 = vld [vmem:[%s1443_s19 + $0x20] sm:$0xff]   ;;  %v1306_v61 = vld [vmem:[%s1443_s19 + $0x28] sm:$0xff]   ;;  %v1308_v63 = vld [vmem:[%s1443_s19 + $0x70] sm:$0xff]  }
  0x27   : > { %1189 = vmatpush3.bf16.msra.mxu1 %v1277_v14  ;;  %1128 = vmatprep.subr.bf16.mxu0 %v1278_v15  ;;  %v1304_v59 = vld [vmem:[%s1443_s19 + $0xa0] sm:$0xff]   ;;  %v1307_v62 = vld [vmem:[%s1443_s19 + $0xa8] sm:$0xff]   ;;  %v1309_v0 = vld [vmem:[%s1443_s19 + $0x30] sm:$0xff]  }
  0x28   : > { %1190 = vmatprep.subr.bf16.mxu1 %v1354_v4  ;;  %v1310_v1 = vld [vmem:[%s1443_s19 + $0xb0] sm:$0xff]   ;;  %v1311_v2 = vld [vmem:[%s1443_s19 + $0x78] sm:$0xff]   ;;  %v1050_v8 = vld [vmem:[%s293_s30] ss:$0 sm:$0xff] }
  0x29   : > { %v1312_v3 = vld [vmem:[%s1443_s19 + $0x38] sm:$0xff]   ;;  %v1083_v38 = vld [vmem:[%s301_s9] ss:$0 sm:$0xff] }
  0x2a   : > { %1129 = vmatpush3.bf16.msra.mxu0 %v1279_v17  ;;  %v1313_v5 = vld [vmem:[%s1443_s19 + $0xb8] sm:$0xff]  }
  0x2b   : > { %1191 = vmatpush3.bf16.msra.mxu1 %v1280_v18  ;;  %1130 = vmatprep.subr.bf16.mxu0 %v1281_v19 }
  0x2c   : > { %1192 = vmatprep.subr.bf16.mxu1 %v1354_v4 }
  0x2e   : > { %1131 = vmatpush3.bf16.msra.mxu0 %v1282_v21 }
  0x2f   : > { %1193 = vmatpush3.bf16.msra.mxu1 %v1283_v22  ;;  %1132 = vmatprep.subr.bf16.mxu0 %v1284_v23 }
  0x30   : > { %1194 = vmatprep.subr.bf16.mxu1 %v1354_v4 }
  0x32   : > { %1133 = vmatpush3.bf16.msra.mxu0 %v1285_v24 }
  0x33   : > { %1195 = vmatpush3.bf16.msra.mxu1 %v1286_v25  ;;  %1134 = vmatprep.subr.bf16.mxu0 %v1287_v29 }
  0x34   : > { %1196 = vmatprep.subr.bf16.mxu1 %v1354_v4 }
  0x36   : > { %1135 = vmatpush3.bf16.msra.mxu0 %v1288_v34 }
  0x37   : > { %1197 = vmatpush3.bf16.msra.mxu1 %v1289_v36  ;;  %1151 = vmatprep.subr.bf16.mxu0 %v1290_v42 }
  0x38   : > { %1202 = vmatprep.subr.bf16.mxu1 %v1354_v4 }
  0x39   : > { %1078 = vmatmul.mubr.msk.bf16.vlgmr.msra.gmra.mrb[0].mxu0 %vm1510_vm6, %v1077_v44 }
  0x3a   : > { %1199 = vmatmul.mubr.msk.bf16.vlgmr.msra.gmra.mrb[0].mxu1 %vm1520_vm7, %v1081_v46  ;;  %1152 = vmatpush3.bf16.msra.mxu0 %v1291_v45 }
  0x3b   : > { %1203 = vmatpush3.bf16.msra.mxu1 %v1292_v47  ;;  %1153 = vmatprep.subr.bf16.mxu0 %v1293_v48 }
  0x3c   : > { %1204 = vmatprep.subr.bf16.mxu1 %v1354_v4  ;;  %1218 = vmatprep.mubr.msk.bf16.mxu1 %vm1355_vm0, %v1354_v4 }
  0x3e   : > { %1154 = vmatpush3.bf16.msra.mxu0 %v1294_v49 }
  0x3f   : > { %1205 = vmatpush3.bf16.msra.mxu1 %v1295_v50  ;;  %1155 = vmatprep.subr.bf16.mxu0 %v1296_v51 }
  0x40   : > { %1206 = vmatprep.subr.bf16.mxu1 %v1354_v4 }
  0x42   : > { %1156 = vmatpush3.bf16.msra.mxu0 %v1297_v52 }
  0x43   : > { %1207 = vmatpush3.bf16.msra.mxu1 %v1298_v53  ;;  %1157 = vmatprep.subr.bf16.mxu0 %v1299_v54 }
  0x44   : > { %1208 = vmatprep.subr.bf16.mxu1 %v1354_v4 }
  0x46   : > { %1158 = vmatpush3.bf16.msra.mxu0 %v1300_v55 }
  0x47   : > { %1209 = vmatpush3.bf16.msra.mxu1 %v1301_v56  ;;  %1159 = vmatprep.subr.bf16.mxu0 %v1302_v57 }
  0x48   : > { %1210 = vmatprep.subr.bf16.mxu1 %v1354_v4 }
  0x4a   : > { %1160 = vmatpush3.bf16.msra.mxu0 %v1303_v58 }
  0x4b   : > { %1211 = vmatpush3.bf16.msra.mxu1 %v1304_v59  ;;  %1161 = vmatprep.subr.bf16.mxu0 %v1305_v60 }
  0x4c   : > { %1212 = vmatprep.subr.bf16.mxu1 %v1354_v4 }
  0x4e   : > { %1162 = vmatpush3.bf16.msra.mxu0 %v1306_v61 }
  0x4f   : > { %1213 = vmatpush3.bf16.msra.mxu1 %v1307_v62  ;;  %1163 = vmatprep.subr.bf16.mxu0 %v1308_v63 }
  0x50   : > { %1214 = vmatprep.subr.bf16.mxu1 %v1354_v4 }
  0x52   : > { %1164 = vmatpush3.bf16.msra.mxu0 %v1309_v0 }
  0x53   : > { %1215 = vmatpush3.bf16.msra.mxu1 %v1310_v1  ;;  %1165 = vmatprep.subr.bf16.mxu0 %v1311_v2 }
  0x54   : > { %1216 = vmatprep.subr.bf16.mxu1 %v1354_v4 }
  0x56   : > { %1166 = vmatpush3.bf16.msra.mxu0 %v1312_v3 }
  0x57   : > { %1217 = vmatpush3.bf16.msra.mxu1 %v1313_v5 }
 0x10c   : > { %v1136_v6 = vpop.f32.mrb[0].mxu0 }
 0x10d   : > { %v1137_v7 = vpop.f32.mrb[1].mxu0  ;;  %v617_v9 = vpop.f32.mrb[0].mxu1 }
 0x10e   : > { %v1138_v10 = vadd.f32 %v1137_v7, %v1136_v6  ;;  %v1139_v11 = vpop.f32.mrb[2].mxu0  ;;  %v1200_v12 = vpop.f32.mrb[1].mxu1 }
 0x10f   : > { %v1140_v13 = vpop.f32.mrb[3].mxu0  ;;  %v620_v14 = vpop.f32.mrb[2].mxu1 }
 0x110   : > { %v577_v15 = vadd.f32 %v1138_v10, %v1050_v8  ;;  %v1141_v4 = vadd.f32 %v1140_v13, %v1139_v11  ;;  %v1201_v16 = vpop.f32.mrb[3].mxu1 }
 0x112   : > { %v618_v17 = vadd.f32 %v617_v9, %v577_v15  ;;  %v580_v18 = vadd.f32 %v1141_v4, %v1050_v8 }
 0x114   : > { %v624_v19 = vmax.f32 %v618_v17, 0.0  ;;  %v621_v21 = vadd.f32 %v620_v14, %v580_v18 }
 0x116   : > { %v625_v22 = vmax.f32 %v621_v21, 0.0  ;;  %v626_v23 = vrot.slane %v624_v19, 1  ;;  %v632_v24 = vrot.slane %v624_v19, 7 }
 0x118   : > { %v627_v25 = vrot.slane %v625_v22, 1  ;;  %v633_v26 = vrot.slane %v625_v22, 7  ;;  %v639_v29 = vpack.c.bf16 %v625_v22, %v624_v19 }
 0x11a   : > { %v628_v30 = vsel %vm326_vm3, %v626_v23, %v627_v25  ;;  %v629_v31 = vsel %vm326_vm3, %v627_v25, %v626_v23  ;;  %v634_v32 = vsel %vm335_vm1, %v632_v24, %v633_v26  ;;  %v635_v33 = vsel %vm335_vm1, %v633_v26, %v632_v24  ;;  %872 = vmatprep.mubr.bf16.mxu0 %v639_v29 }
 0x11b   : > { %v1110_v34 = vpack.c.bf16 %v634_v32, %v635_v33  ;;  %v1114_v35 = vpack.c.bf16 %v629_v31, %v628_v30 }
 0x11d   : > { %1111 = vmatmul.mubr.msk.bf16.vlgmr.msra.gmra.mrb[4].mxu0 %vm1510_vm6, %v1110_v34  ;;  %1219 = vmatmul.mubr.msk.bf16.vlgmr.msra.gmra.mrb[4].mxu1 %vm1520_vm7, %v1114_v35 }
 0x1f0   : > { %v1167_v36 = vpop.f32.mrb[4].mxu0  ;;  %v915_v37 = vpop.f32.mrb[4].mxu1 }
 0x1f1   : > { %v1168_v40 = vpop.f32.mrb[5].mxu0  ;;  %v1220_v20 = vpop.f32.mrb[5].mxu1 }
 0x1f2   : > { %v1169_v41 = vadd.f32 %v1168_v40, %v1167_v36  ;;  %v1170_v42 = vpop.f32.mrb[6].mxu0  ;;  %v918_v44 = vpop.f32.mrb[6].mxu1 }
 0x1f3   : > { %v1171_v45 = vpop.f32.mrb[7].mxu0  ;;  %v1221_v39 = vpop.f32.mrb[7].mxu1 }
 0x1f4   : > { %v875_v46 = vadd.f32 %v1169_v41, %v1083_v38  ;;  %v1172_v47 = vadd.f32 %v1171_v45, %v1170_v42 }
 0x1f6   : > { %v916_v43 = vadd.f32 %v915_v37, %v875_v46  ;;  %v878_v48 = vadd.f32 %v1172_v47, %v1083_v38 }
 0x1f8   : > { %v922_v49 = vmul.f32 0.25, %v916_v43  ;;  %v919_v50 = vadd.f32 %v918_v44, %v878_v48 }
 0x1fa   : > { %v924_v51 = vadd.f32 %v922_v49, %v1487_v27  ;;  %v923_v52 = vmul.f32 0.25, %v919_v50 }
 0x1fc   : > { %926 = vst [vmem:[%s1448_s29] sm:$0xff] %v924_v51  ;;  %v925_v53 = vadd.f32 %v923_v52, %v1490_v28 }
 0x1fe   : > { %927 = vst [vmem:[%s1448_s29 + $0x8] sm:$0xff] %v925_v53 }
 0x1ff PF: > { %s15_s22 = sadd.s32 1, %s1352_s22   ;;  %s1612_s18 = smov %s1344_s20 }
 0x200   : > { %p12_p8 = scmp.ge.s32.totalorder %s15_s22, 10   ;;  %s1613_s19 = smov %s1348_s21 }
 0x201   : > { %s1614_s20 = smov %s1617_s23  ;;  %s1615_s21 = smov %s1621_s24 }
 0x202   :  { %14 = sbr.rel (!%p12_p8) target bundleno = 3 (0x3), region = 86 }

</bundles_post_ra>
